<compile_context>
chip_gen: v5e
topology: v5e:2x2
jax: 0.10.0
libtpu: 0.0.40
codegen_flags: <defaults>
</compile_context>

<pallas_src>
import jax
import jax.numpy as jnp
import numpy as np
from jax.experimental import pallas as pl
from jax.experimental.pallas import tpu as pltpu

EPS = 1e-7          # SpacialConv eps
NEG_SLOPE = 0.01    # F.leaky_relu default negative slope


def spatial_heads_kernel(pos_src_ref, pos_dst_ref, adjn_ref, xexp_ref, xdst_ref,
                         wsp_ref, bsp_ref, wnblk_ref, wself_ref, bvec_ref,
                         out_ref):
    """All heads of MultiHeadSpatialLayer for one tile of destination nodes.

    pos_src_ref : (N, C)         positions of all (source) nodes            [resident]
    pos_dst_ref : (TV, C)        positions of this destination-node tile
    adjn_ref    : (TV, N, 1)     degree-normalized adjacency  adj[v,u]/deg[v]
    xexp_ref    : (N, H*HF)      src features in message layout             [resident]
                                 col h*HF + f*hh + k  ->  x[:, f]
    xdst_ref    : (TV, F)        dst features (for fc_self)
    wsp_ref     : (C, H*HF)      fc_spatial weights, all heads stacked
    bsp_ref     : (1, H*HF)      fc_spatial bias, all heads stacked
    wnblk_ref   : (H*HF, H*O)    block-diagonal fc_neigh weights
    wself_ref   : (F, H*O)       fc_self weights, heads concatenated
    bvec_ref    : (1, H*O)       fc_neigh bias + module bias, concatenated
    out_ref     : (TV, H*O)      merged ('cat') output for this dst tile
    """
    pos_src = pos_src_ref[...]                                          # (N, C)
    pos_dst = pos_dst_ref[...]                                          # (TV, C)
    adjn = adjn_ref[...]                                                # (TV, N, 1)
    x_exp = xexp_ref[...]                                               # (N, H*HF)
    wsp = wsp_ref[...]                                                  # (C, H*HF)

    # --- edge geometry (head-invariant): rel[v, u] = pos_dst[v] - pos_src[u] ---
    rel = pos_dst[:, None, :] - pos_src[None, :, :]                     # (TV, N, C)
    nrm = jnp.sqrt(jnp.sum(rel * rel, axis=-1, keepdims=True)) + EPS    # (TV, N, 1)
    inv_nrm = pl.reciprocal(nrm, approx=False)                          # EUP, exact

    # --- fc_spatial over all heads, hoisted to node level ---------------------
    # ((rel + 1) / nrm) @ Wsp == inv_nrm * (pos_dst@Wsp - pos_src@Wsp + sum_c Wsp[c])
    pd = jnp.dot(pos_dst, wsp, preferred_element_type=jnp.float32)      # (TV, H*HF)
    ps = jnp.dot(pos_src, wsp, preferred_element_type=jnp.float32)      # (N,  H*HF)
    pd = pd + jnp.sum(wsp, axis=0, keepdims=True)                       # fold the "+1"

    s = (pd[:, None, :] - ps[None, :, :]) * inv_nrm + bsp_ref[...]      # (TV, N, H*HF)
    s = jnp.where(s > 0, s, NEG_SLOPE * s)                              # leaky_relu

    # --- per-edge message and mean aggregation over incoming edges ------------
    # e[v, u, h*HF + f*hh + k] = s[v, u, ...] * x[u, f]
    e = s * x_exp[None, :, :]                                           # (TV, N, H*HF)
    neigh = jnp.sum(adjn * e, axis=1)                                   # (TV, H*HF)

    # --- fused output projections (all heads at once, lane-dense store) -------
    h_neigh = jnp.dot(neigh, wnblk_ref[...], preferred_element_type=jnp.float32)
    h_self = jnp.dot(xdst_ref[...], wself_ref[...], preferred_element_type=jnp.float32)
    out_ref[...] = (h_self + h_neigh + bvec_ref[...]).astype(out_ref.dtype)


def multi_head_spatial_layer(x, pos, adj, params, *, tile_dst=None):
    """merge='cat' multi-head spatial layer. Returns (N, num_heads * out_dim)."""
    N, F = x.shape
    C = pos.shape[1]
    H, _, HF = params["wsp_t"].shape
    O = params["wn_t"].shape[2]
    hh = HF // F
    HHF = H * HF
    HO = H * O

    if tile_dst is None:
        tile_dst = N if N <= 128 else 128
    assert N % tile_dst == 0 and (tile_dst == N or tile_dst % 8 == 0)
    grid = (N // tile_dst,)

    # ---- layout-only prep (pure glue; no per-edge compute happens here) ----
    deg = jnp.maximum(jnp.sum(adj, axis=1, keepdims=True), 1.0)
    adj_norm = (adj / deg)[:, :, None].astype(jnp.float32)              # (N, N, 1)
    # src features expanded to the per-head message layout (head-invariant)
    x_exp = jnp.tile(jnp.repeat(x, hh, axis=1), (1, H))                 # (N, H*HF)
    # stack per-head parameters so one kernel call covers every head
    wsp_all = jnp.transpose(params["wsp_t"], (1, 0, 2)).reshape(C, HHF)
    bsp_all = params["bsp"].reshape(1, HHF)
    wself_cat = jnp.transpose(params["wself_t"], (1, 0, 2)).reshape(F, HO)
    bvec = (params["bn"] + params["bias"]).reshape(1, HO)
    wn_blk = jnp.zeros((HHF, HO), jnp.float32)
    for h in range(H):
        wn_blk = wn_blk.at[h * HF:(h + 1) * HF, h * O:(h + 1) * O].set(params["wn_t"][h])

    full2 = lambda i: (0, 0)
    tiled = lambda i: (i, 0)

    return pl.pallas_call(
        spatial_heads_kernel,
        out_shape=jax.ShapeDtypeStruct((N, HO), jnp.float32),
        grid_spec=pltpu.PrefetchScalarGridSpec(
            num_scalar_prefetch=0,
            grid=grid,
            in_specs=[
                pl.BlockSpec((N, C), full2),                     # pos (all src nodes)
                pl.BlockSpec((tile_dst, C), tiled),              # pos (dst tile)
                pl.BlockSpec((tile_dst, N, 1), lambda i: (i, 0, 0)),  # adj/deg (dst tile)
                pl.BlockSpec((N, HHF), full2),                   # x expanded (src nodes)
                pl.BlockSpec((tile_dst, F), tiled),              # x (dst tile, fc_self)
                pl.BlockSpec((C, HHF), full2),                   # fc_spatial W (all heads)
                pl.BlockSpec((1, HHF), full2),                   # fc_spatial b (all heads)
                pl.BlockSpec((HHF, HO), full2),                  # fc_neigh W (block-diag)
                pl.BlockSpec((F, HO), full2),                    # fc_self W (concat)
                pl.BlockSpec((1, HO), full2),                    # fc_neigh b + module bias
            ],
            out_specs=pl.BlockSpec((tile_dst, HO), tiled),
        ),
        compiler_params=pltpu.CompilerParams(
            dimension_semantics=("parallel",)),
    )(pos, pos, adj_norm, x_exp, x,
      wsp_all, bsp_all, wn_blk, wself_cat, bvec)


def reference(x, pos, adj, params):
    """Pure-JAX reference reproducing SpacialConv / MultiHeadSpatialLayer math."""
    N, F = x.shape
    H, _, HF = params["wsp_t"].shape
    hh = HF // F
    deg = jnp.maximum(jnp.sum(adj, axis=1), 1.0)
    outs = []
    for h in range(H):
        wsp_t = params["wsp_t"][h]
        bsp = params["bsp"][h, 0]
        wn_t = params["wn_t"][h]
        bn = params["bn"][h, 0]
        wself_t = params["wself_t"][h]
        bias = params["bias"][h, 0]

        rel = pos[:, None, :] - pos[None, :, :]                 # [dst v, src u, :]
        nrm = jnp.linalg.norm(rel, axis=-1, keepdims=True) + EPS
        ws = (rel + 1.0) / nrm
        s = jax.nn.leaky_relu(ws @ wsp_t + bsp, NEG_SLOPE)      # (N, N, HF)
        e = s.reshape(N, N, F, hh) * x[None, :, :, None]        # src feats broadcast
        e = e.reshape(N, N, HF)
        neigh = jnp.sum(adj[:, :, None] * e, axis=1) / deg[:, None]
        out = x @ wself_t + neigh @ wn_t + bn + bias
        outs.append(out)
    return jnp.concatenate(outs, axis=1)


def init_params(key, num_heads, coors, in_dim, out_dim, hidden_size):
    HF = hidden_size * in_dim
    ks = jax.random.split(key, 5)
    scale = 0.2
    return {
        # pre-transposed weights so the kernel uses plain row-major matmuls
        "wsp_t": scale * jax.random.normal(ks[0], (num_heads, coors, HF), jnp.float32),
        "bsp": scale * jax.random.normal(ks[1], (num_heads, 1, HF), jnp.float32),
        "wn_t": scale * jax.random.normal(ks[2], (num_heads, HF, out_dim), jnp.float32),
        "bn": scale * jax.random.normal(ks[3], (num_heads, 1, out_dim), jnp.float32),
        "wself_t": scale * jax.random.normal(ks[4], (num_heads, in_dim, out_dim), jnp.float32),
        "bias": jnp.zeros((num_heads, 1, out_dim), jnp.float32),  # nn.Parameter(zeros)
    }


if __name__ == "__main__":
    # Small, TPU-friendly sizes consistent with the module.
    N = 8            # number of graph nodes
    coors = 3        # position dimensionality
    in_dim = 4       # node feature dim
    hidden_size = 8  # SpacialConv hidden_size  -> HF = 32
    out_dim = 16     # per-head output dim
    num_heads = 2    # concatenated -> (N, 32)

    key = jax.random.PRNGKey(0)
    kx, kp, kw = jax.random.split(key, 3)

    x = jax.random.normal(kx, (N, in_dim), jnp.float32)
    pos = jax.random.normal(kp, (N, coors), jnp.float32)

    # Deterministic ring graph: node v receives edges from (v-1)%N and (v+1)%N.
    idx = np.arange(N)
    adj_np = np.zeros((N, N), np.float32)
    adj_np[idx, (idx - 1) % N] = 1.0
    adj_np[idx, (idx + 1) % N] = 1.0
    adj = jnp.asarray(adj_np)

    params = init_params(kw, num_heads, coors, in_dim, out_dim, hidden_size)

    out = multi_head_spatial_layer(x, pos, adj, params)
    out = jax.block_until_ready(out)

    ref = jax.block_until_ready(reference(x, pos, adj, params))
    np.testing.assert_allclose(np.asarray(out), np.asarray(ref), rtol=1e-4, atol=1e-4)
    assert out.shape == (N, num_heads * out_dim)

    print("KERNEL_OK")
</pallas_src>

<mosaic_0001>
module attributes {stable_mosaic.version = 11 : i64} {
  func.func @spatial_heads_kernel(%arg0: i32, %arg1: memref<8x3xf32, #tpu.memory_space<vmem>>, %arg2: memref<8x3xf32, #tpu.memory_space<vmem>>, %arg3: memref<8x8x1xf32, #tpu.memory_space<vmem>>, %arg4: memref<8x64xf32, #tpu.memory_space<vmem>>, %arg5: memref<8x4xf32, #tpu.memory_space<vmem>>, %arg6: memref<3x64xf32, #tpu.memory_space<vmem>>, %arg7: memref<1x64xf32, #tpu.memory_space<vmem>>, %arg8: memref<64x32xf32, #tpu.memory_space<vmem>>, %arg9: memref<4x32xf32, #tpu.memory_space<vmem>>, %arg10: memref<1x32xf32, #tpu.memory_space<vmem>>, %arg11: memref<8x32xf32, #tpu.memory_space<vmem>>) attributes {dimension_semantics = [#tpu.dimension_semantics<parallel>], iteration_bounds = array<i64: 1>, scalar_prefetch = 0 : i64, scratch_operands = 0 : i64, tpu.core_type = #tpu.core_type<tc>, window_params = [{pipeline_mode = #tpu.pipeline_mode<synchronous>, transform_indices = @transform_0, window_bounds = array<i64: 8, 3>}, {transform_indices = @transform_1, window_bounds = array<i64: 8, 3>}, {transform_indices = @transform_2, window_bounds = array<i64: 8, 8, 1>}, {pipeline_mode = #tpu.pipeline_mode<synchronous>, transform_indices = @transform_3, window_bounds = array<i64: 8, 64>}, {transform_indices = @transform_4, window_bounds = array<i64: 8, 4>}, {pipeline_mode = #tpu.pipeline_mode<synchronous>, transform_indices = @transform_5, window_bounds = array<i64: 3, 64>}, {pipeline_mode = #tpu.pipeline_mode<synchronous>, transform_indices = @transform_6, window_bounds = array<i64: 1, 64>}, {pipeline_mode = #tpu.pipeline_mode<synchronous>, transform_indices = @transform_7, window_bounds = array<i64: 64, 32>}, {pipeline_mode = #tpu.pipeline_mode<synchronous>, transform_indices = @transform_8, window_bounds = array<i64: 4, 32>}, {pipeline_mode = #tpu.pipeline_mode<synchronous>, transform_indices = @transform_9, window_bounds = array<i64: 1, 32>}, {transform_indices = @transform_10, window_bounds = array<i64: 8, 32>}]} {
    %c0 = arith.constant 0 : index
    %c0_0 = arith.constant 0 : index
    %0 = vector.load %arg1[%c0, %c0_0] : memref<8x3xf32, #tpu.memory_space<vmem>>, vector<8x3xf32>
    %c0_1 = arith.constant 0 : index
    %c0_2 = arith.constant 0 : index
    %1 = vector.load %arg2[%c0_1, %c0_2] : memref<8x3xf32, #tpu.memory_space<vmem>>, vector<8x3xf32>
    %c0_3 = arith.constant 0 : index
    %c0_4 = arith.constant 0 : index
    %c0_5 = arith.constant 0 : index
    %2 = vector.load %arg3[%c0_3, %c0_4, %c0_5] : memref<8x8x1xf32, #tpu.memory_space<vmem>>, vector<8x8x1xf32>
    %c0_6 = arith.constant 0 : index
    %c0_7 = arith.constant 0 : index
    %3 = vector.load %arg4[%c0_6, %c0_7] : memref<8x64xf32, #tpu.memory_space<vmem>>, vector<8x64xf32>
    %c0_8 = arith.constant 0 : index
    %c0_9 = arith.constant 0 : index
    %4 = vector.load %arg6[%c0_8, %c0_9] : memref<3x64xf32, #tpu.memory_space<vmem>>, vector<3x64xf32>
    %5 = vector.shape_cast %1 : vector<8x3xf32> to vector<8x1x3xf32>
    %6 = vector.shape_cast %0 : vector<8x3xf32> to vector<1x8x3xf32>
    %7 = vector.broadcast %5 : vector<8x1x3xf32> to vector<8x8x3xf32>
    %8 = vector.broadcast %6 : vector<1x8x3xf32> to vector<8x8x3xf32>
    %9 = arith.subf %7, %8 : vector<8x8x3xf32>
    %10 = arith.mulf %9, %9 : vector<8x8x3xf32>
    %cst = arith.constant dense<0.000000e+00> : vector<8x8xf32>
    %11 = vector.multi_reduction <add>, %10, %cst [2] : vector<8x8x3xf32> to vector<8x8xf32>
    %12 = vector.shape_cast %11 : vector<8x8xf32> to vector<8x8x1xf32>
    %13 = math.sqrt %12 : vector<8x8x1xf32>
    %cst_10 = arith.constant 1.000000e-07 : f32
    %14 = vector.broadcast %cst_10 : f32 to vector<8x8x1xf32>
    %15 = arith.addf %13, %14 : vector<8x8x1xf32>
    %16 = tpu.reciprocal %15 : vector<8x8x1xf32> -> vector<8x8x1xf32>
    %cst_11 = arith.constant dense<0.000000e+00> : vector<8x64xf32>
    %17 = tpu.matmul %1, %4, %cst_11 {dimension_numbers = #tpu.dot_dimension_numbers<[1], [0], [0], [1], [0, 0, 1, 1], [], []>} : vector<8x3xf32>, vector<3x64xf32>, vector<8x64xf32> -> vector<8x64xf32>
    %cst_12 = arith.constant dense<0.000000e+00> : vector<8x64xf32>
    %18 = tpu.matmul %0, %4, %cst_12 {dimension_numbers = #tpu.dot_dimension_numbers<[1], [0], [0], [1], [0, 0, 1, 1], [], []>} : vector<8x3xf32>, vector<3x64xf32>, vector<8x64xf32> -> vector<8x64xf32>
    %cst_13 = arith.constant dense<0.000000e+00> : vector<64xf32>
    %19 = vector.multi_reduction <add>, %4, %cst_13 [0] : vector<3x64xf32> to vector<64xf32>
    %20 = vector.shape_cast %19 : vector<64xf32> to vector<1x64xf32>
    %21 = vector.broadcast %20 : vector<1x64xf32> to vector<8x64xf32>
    %22 = arith.addf %17, %21 : vector<8x64xf32>
    %23 = vector.shape_cast %22 : vector<8x64xf32> to vector<8x1x64xf32>
    %24 = vector.shape_cast %18 : vector<8x64xf32> to vector<1x8x64xf32>
    %25 = vector.broadcast %23 : vector<8x1x64xf32> to vector<8x8x64xf32>
    %26 = vector.broadcast %24 : vector<1x8x64xf32> to vector<8x8x64xf32>
    %27 = arith.subf %25, %26 : vector<8x8x64xf32>
    %28 = vector.broadcast %16 : vector<8x8x1xf32> to vector<8x8x64xf32>
    %29 = arith.mulf %27, %28 : vector<8x8x64xf32>
    %c0_14 = arith.constant 0 : index
    %c0_15 = arith.constant 0 : index
    %30 = vector.load %arg7[%c0_14, %c0_15] : memref<1x64xf32, #tpu.memory_space<vmem>>, vector<1x64xf32>
    %31 = vector.shape_cast %30 : vector<1x64xf32> to vector<1x1x64xf32>
    %32 = vector.broadcast %31 : vector<1x1x64xf32> to vector<8x8x64xf32>
    %33 = arith.addf %29, %32 : vector<8x8x64xf32>
    %cst_16 = arith.constant 0.000000e+00 : f32
    %34 = vector.broadcast %cst_16 : f32 to vector<8x8x64xf32>
    %35 = arith.cmpf ogt, %33, %34 : vector<8x8x64xf32>
    %cst_17 = arith.constant 0.00999999977 : f32
    %36 = vector.broadcast %cst_17 : f32 to vector<8x8x64xf32>
    %37 = arith.mulf %36, %33 : vector<8x8x64xf32>
    %38 = arith.select %35, %33, %37 : vector<8x8x64xi1>, vector<8x8x64xf32>
    %39 = vector.shape_cast %3 : vector<8x64xf32> to vector<1x8x64xf32>
    %40 = vector.broadcast %39 : vector<1x8x64xf32> to vector<8x8x64xf32>
    %41 = arith.mulf %38, %40 : vector<8x8x64xf32>
    %42 = vector.broadcast %2 : vector<8x8x1xf32> to vector<8x8x64xf32>
    %43 = arith.mulf %42, %41 : vector<8x8x64xf32>
    %cst_18 = arith.constant dense<0.000000e+00> : vector<8x64xf32>
    %44 = vector.multi_reduction <add>, %43, %cst_18 [1] : vector<8x8x64xf32> to vector<8x64xf32>
    %c0_19 = arith.constant 0 : index
    %c0_20 = arith.constant 0 : index
    %45 = vector.load %arg8[%c0_19, %c0_20] : memref<64x32xf32, #tpu.memory_space<vmem>>, vector<64x32xf32>
    %cst_21 = arith.constant dense<0.000000e+00> : vector<8x32xf32>
    %46 = tpu.matmul %44, %45, %cst_21 {dimension_numbers = #tpu.dot_dimension_numbers<[1], [0], [0], [1], [0, 0, 1, 1], [], []>} : vector<8x64xf32>, vector<64x32xf32>, vector<8x32xf32> -> vector<8x32xf32>
    %c0_22 = arith.constant 0 : index
    %c0_23 = arith.constant 0 : index
    %47 = vector.load %arg5[%c0_22, %c0_23] : memref<8x4xf32, #tpu.memory_space<vmem>>, vector<8x4xf32>
    %c0_24 = arith.constant 0 : index
    %c0_25 = arith.constant 0 : index
    %48 = vector.load %arg9[%c0_24, %c0_25] : memref<4x32xf32, #tpu.memory_space<vmem>>, vector<4x32xf32>
    %cst_26 = arith.constant dense<0.000000e+00> : vector<8x32xf32>
    %49 = tpu.matmul %47, %48, %cst_26 {dimension_numbers = #tpu.dot_dimension_numbers<[1], [0], [0], [1], [0, 0, 1, 1], [], []>} : vector<8x4xf32>, vector<4x32xf32>, vector<8x32xf32> -> vector<8x32xf32>
    %50 = arith.addf %49, %46 : vector<8x32xf32>
    %c0_27 = arith.constant 0 : index
    %c0_28 = arith.constant 0 : index
    %51 = vector.load %arg10[%c0_27, %c0_28] : memref<1x32xf32, #tpu.memory_space<vmem>>, vector<1x32xf32>
    %52 = vector.broadcast %51 : vector<1x32xf32> to vector<8x32xf32>
    %53 = arith.addf %50, %52 : vector<8x32xf32>
    %c0_29 = arith.constant 0 : index
    %c0_30 = arith.constant 0 : index
    %54 = vector.load %arg11[%c0_29, %c0_30] : memref<8x32xf32, #tpu.memory_space<vmem>>, vector<8x32xf32>
    tpu.vector_store %arg11[%c0_29, %c0_30], %53 {strides = array<i32>} : memref<8x32xf32, #tpu.memory_space<vmem>>, vector<8x32xf32>,
    return
  }
  func.func @transform_0(%arg0: i32) -> (i32, i32) {
    %c0_i32 = arith.constant 0 : i32
    %c0_i32_0 = arith.constant 0 : i32
    %c0_i32_1 = arith.constant 0 : i32
    return %c0_i32, %c0_i32_0 : i32, i32
  }
  func.func @transform_1(%arg0: i32) -> (i32, i32) {
    %c0_i32 = arith.constant 0 : i32
    %c0_i32_0 = arith.constant 0 : i32
    return %arg0, %c0_i32 : i32, i32
  }
  func.func @transform_2(%arg0: i32) -> (i32, i32, i32) {
    %c0_i32 = arith.constant 0 : i32
    %c0_i32_0 = arith.constant 0 : i32
    %c0_i32_1 = arith.constant 0 : i32
    return %arg0, %c0_i32, %c0_i32_0 : i32, i32, i32
  }
  func.func @transform_3(%arg0: i32) -> (i32, i32) {
    %c0_i32 = arith.constant 0 : i32
    %c0_i32_0 = arith.constant 0 : i32
    %c0_i32_1 = arith.constant 0 : i32
    return %c0_i32, %c0_i32_0 : i32, i32
  }
  func.func @transform_4(%arg0: i32) -> (i32, i32) {
    %c0_i32 = arith.constant 0 : i32
    %c0_i32_0 = arith.constant 0 : i32
    return %arg0, %c0_i32 : i32, i32
  }
  func.func @transform_5(%arg0: i32) -> (i32, i32) {
    %c0_i32 = arith.constant 0 : i32
    %c0_i32_0 = arith.constant 0 : i32
    %c0_i32_1 = arith.constant 0 : i32
    return %c0_i32, %c0_i32_0 : i32, i32
  }
  func.func @transform_6(%arg0: i32) -> (i32, i32) {
    %c0_i32 = arith.constant 0 : i32
    %c0_i32_0 = arith.constant 0 : i32
    %c0_i32_1 = arith.constant 0 : i32
    return %c0_i32, %c0_i32_0 : i32, i32
  }
  func.func @transform_7(%arg0: i32) -> (i32, i32) {
    %c0_i32 = arith.constant 0 : i32
    %c0_i32_0 = arith.constant 0 : i32
    %c0_i32_1 = arith.constant 0 : i32
    return %c0_i32, %c0_i32_0 : i32, i32
  }
  func.func @transform_8(%arg0: i32) -> (i32, i32) {
    %c0_i32 = arith.constant 0 : i32
    %c0_i32_0 = arith.constant 0 : i32
    %c0_i32_1 = arith.constant 0 : i32
    return %c0_i32, %c0_i32_0 : i32, i32
  }
  func.func @transform_9(%arg0: i32) -> (i32, i32) {
    %c0_i32 = arith.constant 0 : i32
    %c0_i32_0 = arith.constant 0 : i32
    %c0_i32_1 = arith.constant 0 : i32
    return %c0_i32, %c0_i32_0 : i32, i32
  }
  func.func @transform_10(%arg0: i32) -> (i32, i32) {
    %c0_i32 = arith.constant 0 : i32
    %c0_i32_0 = arith.constant 0 : i32
    return %arg0, %c0_i32 : i32, i32
  }
}

</mosaic_0001>

<bundles_post_ra>
// kernel: tpu_custom_call.1
= control target key start
LH: loop header
LB: loop body
LE: loop exit
PB: predicated region body
PF: predicated region fallthrough
CT: control target
= control target key end

     0   :  { %vm88_vm0 = vcmask 23552   ;;  %vm332_vm1 = vcmask 1042432   ;;  %s1215_s0 = inlined_call_operand.vmem [shape: f32[8,3], index: 0, kind: input, shape index: {}]   ;;  %s1216_s1 = inlined_call_operand.vmem [shape: f32[8,3], index: 1, kind: input, shape index: {}]   ;;  %s1217_s2 = inlined_call_operand.vmem [shape: f32[8,8,1], index: 2, kind: input, shape index: {}]   ;;  %s1218_s3 = inlined_call_operand.vmem [shape: f32[8,64], index: 3, kind: input, shape index: {}]   ;;  %s1219_s4 = inlined_call_operand.vmem [shape: f32[8,4], index: 4, kind: input, shape index: {}]   ;;  %s1220_s5 = inlined_call_operand.vmem [shape: f32[3,64], index: 5, kind: input, shape index: {}]   ;;  %s1221_s6 = inlined_call_operand.vmem [shape: f32[1,64], index: 6, kind: input, shape index: {}]   ;;  %s1222_s7 = inlined_call_operand.vmem [shape: f32[64,32], index: 7, kind: input, shape index: {}]   ;;  %s1223_s8 = inlined_call_operand.vmem [shape: f32[4,32], index: 8, kind: input, shape index: {}]   ;;  %s1224_s9 = inlined_call_operand.vmem [shape: f32[1,32], index: 9, kind: input, shape index: {}]   ;;  %s1225_s10 = inlined_call_operand.hbm [shape: f32[8,32], index: 10, kind: output, shape index: {}]  }
   0x1   :  { %v36_v0 = vld [vmem:[%s1215_s0] sm:$0xff] }
   0x2   :  { %v37_v1 = vld [vmem:[%s1216_s1] sm:$0xff] }
   0x3   :  { %v818_v2 = vld [vmem:[%s1220_s5] sm:$0x7]  ;;  %v56_v3 = vperm.slane %v37_v1, 0  ;;  %v52_v4 = vrot.slane %v37_v1, 4  ;;  %v50_v5 = vrot.slane %v37_v1, 2  ;;  %v49_v6 = vrot.slane %v37_v1, 1 }
   0x4   :  { %682 = vmatpush.msk.msra.mxu1 %vm332_vm1, %v818_v2  ;;  %680 = vmatpush.msk.msra.mxu0 %vm332_vm1, %v818_v2  ;;  %v53_v7 = vrot.slane %v37_v1, 5  ;;  %v51_v8 = vrot.slane %v37_v1, 3  ;;  %v54_v15 = vrot.slane %v37_v1, 6 }
   0x5   :  { %683 = vmatmul.msk.f32.vlgmr.msra.gmra.mxu1 %vm88_vm0, %v37_v1  ;;  %681 = vmatmul.msk.f32.vlgmr.msra.gmra.mxu0 %vm88_vm0, %v36_v0  ;;  %v72_v9 = vsub.f32 %v56_v3, %v36_v0  ;;  %v60_v10 = vperm.slane %v52_v4, 0  ;;  %v58_v11 = vperm.slane %v50_v5, 0  ;;  %v57_v12 = vperm.slane %v49_v6, 0 }
   0x6   :  { %v61_v13 = vperm.slane %v53_v7, 0  ;;  %v59_v14 = vperm.slane %v51_v8, 0 }
   0x7   :  { %15 = vsyncpa [#allocation3], 0  ;;  %v80_v16 = vmul.f32 %v72_v9, %v72_v9  ;;  %v76_v17 = vsub.f32 %v60_v10, %v36_v0  ;;  %v74_v18 = vsub.f32 %v58_v11, %v36_v0  ;;  %v73_v19 = vsub.f32 %v57_v12, %v36_v0  ;;  %v38_v43 = vld [vmem:[%s1217_s2] sm:$0xff]  ;;  %v39_v44 = vld [vmem:[%s1217_s2 + $0x8] sm:$0xff]  ;;  %s753_s29 = smov [#allocation2]   ;;  %s671_s12 = sshll.u32 %s1225_s10, 4  ;;  %s672_s12 = int_to_ptr.hbm [resolvable:$true] %s671_s12 }
   0x8   :  { %v77_v20 = vsub.f32 %v61_v13, %v36_v0  ;;  %v55_v21 = vrot.slane %v37_v1, 7  ;;  %v75_v25 = vsub.f32 %v59_v14, %v36_v0  ;;  %v62_v29 = vperm.slane %v54_v15, 0  ;;  %v41_v45 = vld [vmem:[%s1217_s2 + $0x18] sm:$0xff]  ;;  %v40_v46 = vld [vmem:[%s1217_s2 + $0x10] sm:$0xff]  ;;  %v42_v47 = vld [vmem:[%s1217_s2 + $0x20] sm:$0xff]  ;;  %s669_s30 = sshll.u32 %s753_s29, 4  ;;  %s670_s30 = int_to_ptr.vmem [resolvable:$true] %s669_s30 }
   0x9   :  { %v89_v22 = vsel %vm88_vm0, %v80_v16, 0.0  ;;  %v84_v23 = vmul.f32 %v76_v17, %v76_v17  ;;  %v82_v24 = vmul.f32 %v74_v18, %v74_v18  ;;  %v81_v28 = vmul.f32 %v73_v19, %v73_v19  ;;  %v43_v48 = vld [vmem:[%s1217_s2 + $0x28] sm:$0xff]  ;;  %v44_v49 = vld [vmem:[%s1217_s2 + $0x30] sm:$0xff]  ;;  %v45_v50 = vld [vmem:[%s1217_s2 + $0x38] sm:$0xff] }
   0xa   :  { %90 = vadd.xlane.f32.xlu0 %v89_v22  ;;  %v85_v30 = vmul.f32 %v77_v20, %v77_v20  ;;  %v83_v31 = vmul.f32 %v75_v25, %v75_v25  ;;  %v63_v32 = vperm.slane %v55_v21, 0  ;;  %v752_v33 = vmov 0  }
   0xb   :  { %v101_v26 = vsel %vm88_vm0, %v84_v23, 0.0  ;;  %v95_v27 = vsel %vm88_vm0, %v82_v24, 0.0  ;;  %691 = vset.pattern.permute.xlu1 %v752_v33  ;;  %689 = vset.pattern.permute.xlu2 %v752_v33  ;;  %v92_v34 = vsel %vm88_vm0, %v81_v28, 0.0  ;;  %v78_v35 = vsub.f32 %v62_v29, %v36_v0 }
   0xc   :  { %102 = vadd.xlane.f32.xlu2 %v101_v26  ;;  %96 = vadd.xlane.f32.xlu1 %v95_v27  ;;  %v104_v36 = vsel %vm88_vm0, %v85_v30, 0.0  ;;  %v98_v37 = vsel %vm88_vm0, %v83_v31, 0.0  ;;  %v79_v38 = vsub.f32 %v63_v32, %v36_v0  ;;  %vm356_vm2 = vcmask 518144  }
   0xd   :  { %690 = vset.pattern.permute.xlu0 %v752_v33  ;;  %v86_v39 = vmul.f32 %v78_v35, %v78_v35  ;;  %v357_v51 = vsel %vm356_vm2, %v818_v2, 0.0 }
   0xe   :  { %v87_v40 = vmul.f32 %v79_v38, %v79_v38  ;;  %v358_v53 = vrot.slane %v357_v51, 4 }
   0xf   :  { %v107_v41 = vsel %vm88_vm0, %v86_v39, 0.0 }
  0x10   :  { %v110_v42 = vsel %vm88_vm0, %v87_v40, 0.0  ;;  %v359_v56 = vadd.f32 %v358_v53, %v357_v51 }
  0x12   :  { %93 = vadd.xlane.f32.xlu0 %v92_v34  ;;  %v360_v61 = vrot.slane %v359_v56, 2 }
  0x14   :  { %105 = vadd.xlane.f32.xlu2 %v104_v36  ;;  %99 = vadd.xlane.f32.xlu1 %v98_v37  ;;  %v361_v7 = vadd.f32 %v360_v61, %v359_v56 }
  0x16   :  { %v362_v20 = vrot.slane %v361_v7, 1 }
  0x18   :  { %v363_v37 = vadd.f32 %v362_v20, %v361_v7 }
  0x1a   :  { %108 = vadd.xlane.f32.xlu0 %v107_v41 }
  0x1c   :  { %111 = vadd.xlane.f32.xlu1 %v110_v42 }
  0x2c   :  { %472 = vperm.xlu2 %689, %v38_v43  }
  0x2e   :  { %477 = vperm.xlu0 %690, %v39_v44  }
  0x34   :  { %487 = vperm.xlu2 %689, %v41_v45  }
  0x35   :  { %482 = vperm.xlu1 %691, %v40_v46  }
  0x3c   :  { %492 = vperm.xlu2 %689, %v42_v47  }
  0x3d   :  { %497 = vperm.xlu1 %691, %v43_v48  }
  0x44   :  { %502 = vperm.xlu2 %689, %v44_v49  }
  0x45   :  { %507 = vperm.xlu1 %691, %v45_v50  }
  0x7d   :  { %v91_v52 = vpop.xlane.xlu0 %90 }
  0x7e   :  { %694 = vrsqrt.f32 %v91_v52  ;;  %vm120_vm3 = vcmp.eq.f32.partialorder %v91_v52, inf  ;;  %vm122_vm4 = vcmp.eq.f32.partialorder %v91_v52, 0.0  ;;  %v123_v11 = vand.u32 2147483648, %v91_v52 }
  0x7f   :  { %v857_v54 = vpop.xlane.xlu2 %102  ;;  %v859_v55 = vpop.xlane.xlu1 %96 }
  0x80   :  { %696 = vrsqrt.f32 %v857_v54  ;;  %vm168_vm5 = vcmp.eq.f32.partialorder %v857_v54, inf  ;;  %vm170_vm6 = vcmp.eq.f32.partialorder %v857_v54, 0.0  ;;  %v171_v18 = vand.u32 2147483648, %v857_v54 }
  0x81   :  { %698 = vrsqrt.f32 %v859_v55  ;;  %vm144_vm7 = vcmp.eq.f32.partialorder %v859_v55, inf  ;;  %v147_v28 = vand.u32 2147483648, %v859_v55  ;;  %vm146_vm9 = vcmp.eq.f32.partialorder %v859_v55, 0.0 }
  0x82   :  { %v383_v53 = vpop.f32.mrf.mxu1 }
  0x84   :  { %v695_v57 = vpop.eup %694 }
  0x85   :  { %v114_v58 = vmul.f32 %v695_v57, %v91_v52  ;;  %v863_v59 = vpop.xlane.xlu0 %93 }
  0x86   :  { %v697_v60 = vpop.eup %696  ;;  %700 = vrsqrt.f32 %v863_v59  ;;  %vm132_vm8 = vcmp.eq.f32.partialorder %v863_v59, inf  ;;  %v135_v35 = vand.u32 2147483648, %v863_v59  ;;  %vm134_vm10 = vcmp.eq.f32.partialorder %v863_v59, 0.0 }
  0x87   :  { %v699_v62 = vpop.eup %698  ;;  %v115_v63 = vmul.f32 %v695_v57, %v114_v58  ;;  %v162_v0 = vmul.f32 %v697_v60, %v857_v54  ;;  %v867_v1 = vpop.xlane.xlu2 %105 }
  0x88   :  { %v869_v2 = vpop.xlane.xlu1 %99  ;;  %v138_v3 = vmul.f32 %v699_v62, %v859_v55  ;;  %702 = vrsqrt.f32 %v867_v1  ;;  %vm180_vm11 = vcmp.eq.f32.partialorder %v867_v1, inf  ;;  %vm182_vm12 = vcmp.eq.f32.partialorder %v867_v1, 0.0 }
  0x89   :  { %v116_v4 = vmul.f32 0.5, %v115_v63  ;;  %v163_v5 = vmul.f32 %v697_v60, %v162_v0  ;;  %704 = vrsqrt.f32 %v869_v2  ;;  %v183_v48 = vand.u32 2147483648, %v867_v1 }
  0x8a   :  { %v139_v6 = vmul.f32 %v699_v62, %v138_v3  ;;  %vm156_vm13 = vcmp.eq.f32.partialorder %v869_v2, inf  ;;  %vm158_vm14 = vcmp.eq.f32.partialorder %v869_v2, 0.0  ;;  %v920_v0 = vadd.f32 %v383_v53, %v363_v37 }
  0x8b   :  { %v117_v8 = vsub.f32 1.5, %v116_v4  ;;  %v164_v9 = vmul.f32 0.5, %v163_v5 }
  0x8c   :  { %v701_v10 = vpop.eup %700  ;;  %v140_v12 = vmul.f32 0.5, %v139_v6 }
  0x8d   :  { %v118_v13 = vmul.f32 %v695_v57, %v117_v8  ;;  %v165_v14 = vsub.f32 1.5, %v164_v9  ;;  %v126_v15 = vmul.f32 %v701_v10, %v863_v59  ;;  %v877_v16 = vpop.xlane.xlu0 %108 }
  0x8e   :  { %v703_v17 = vpop.eup %702  ;;  %v141_v19 = vsub.f32 1.5, %v140_v12  ;;  %706 = vrsqrt.f32 %v877_v16  ;;  %vm192_vm15 = vcmp.eq.f32.partialorder %v877_v16, inf  ;;  %vm194_vm0 = vcmp.eq.f32.partialorder %v877_v16, 0.0 }
  0x8f   :  { %v705_v21 = vpop.eup %704  ;;  %v119_v22 = vmul.f32 %v118_v13, %v91_v52  ;;  %v166_v23 = vmul.f32 %v697_v60, %v165_v14  ;;  %v127_v24 = vmul.f32 %v701_v10, %v126_v15  ;;  %v174_v25 = vmul.f32 %v703_v17, %v867_v1 }
  0x90   :  { %v883_v26 = vpop.xlane.xlu1 %111  ;;  %v142_v27 = vmul.f32 %v699_v62, %v141_v19  ;;  %v150_v29 = vmul.f32 %v705_v21, %v869_v2  ;;  %v159_v62 = vand.u32 2147483648, %v869_v2  ;;  %v195_v9 = vand.u32 2147483648, %v877_v16 }
  0x91   :  { %708 = vrsqrt.f32 %v883_v26  ;;  %v121_v30 = vsel %vm120_vm3, %v91_v52, %v119_v22  ;;  %v167_v31 = vmul.f32 %v166_v23, %v857_v54  ;;  %v128_v32 = vmul.f32 0.5, %v127_v24 }
  0x92   :  { %v175_v33 = vmul.f32 %v703_v17, %v174_v25  ;;  %v124_v34 = vsel %vm122_vm4, %v123_v11, %v121_v30  ;;  %v151_v36 = vmul.f32 %v705_v21, %v150_v29  ;;  %v143_v44 = vmul.f32 %v142_v27, %v859_v55 }
  0x93   :  { %v894_v38 = vadd.f32 1e-07, %v124_v34  ;;  %v169_v39 = vsel %vm168_vm5, %v857_v54, %v167_v31  ;;  %v129_v40 = vsub.f32 1.5, %v128_v32  ;;  %vm204_vm1 = vcmp.eq.f32.partialorder %v883_v26, inf }
  0x94   :  { %v176_v41 = vmul.f32 0.5, %v175_v33  ;;  %v707_v42 = vpop.eup %706  ;;  %v172_v43 = vsel %vm170_vm6, %v171_v18, %v169_v39  ;;  %v152_v45 = vmul.f32 0.5, %v151_v36  ;;  %v145_v57 = vsel %vm144_vm7, %v859_v55, %v143_v44 }
  0x95   :  { %710 = vrcp.f32 %v894_v38  ;;  %v905_v46 = vadd.f32 1e-07, %v172_v43  ;;  %v130_v47 = vmul.f32 %v701_v10, %v129_v40  ;;  %v186_v52 = vmul.f32 %v707_v42, %v877_v16 }
  0x96   :  { %v177_v50 = vsub.f32 1.5, %v176_v41  ;;  %v153_v51 = vsub.f32 1.5, %v152_v45  ;;  %v148_v8 = vsel %vm146_vm9, %v147_v28, %v145_v57  ;;  %vm206_vm2 = vcmp.eq.f32.partialorder %v883_v26, 0.0  ;;  %v995_v45 = vpop.f32.mrf.mxu0 }
  0x97   :  { %v709_v49 = vpop.eup %708  ;;  %712 = vrcp.f32 %v905_v46  ;;  %v131_v54 = vmul.f32 %v130_v47, %v863_v59  ;;  %v187_v61 = vmul.f32 %v707_v42, %v186_v52  ;;  %v950_v23 = vadd.f32 1e-07, %v148_v8 }
  0x98   :  { %v198_v56 = vmul.f32 %v709_v49, %v883_v26  ;;  %v178_v58 = vmul.f32 %v703_v17, %v177_v50  ;;  %v154_v60 = vmul.f32 %v705_v21, %v153_v51  ;;  %v226_v25 = vand.u32 2147483647, %v894_v38  ;;  %v1003_v51 = vpop.permute.xlu2 %472 }
  0x99   :  { %v133_v3 = vsel %vm132_vm8, %v863_v59, %v131_v54  ;;  %v188_v6 = vmul.f32 0.5, %v187_v61  ;;  %v207_v32 = vand.u32 2147483648, %v883_v26  ;;  %vm222_vm4 = vweird.f32 %v894_v38 }
  0x9a   :  { %v199_v63 = vmul.f32 %v709_v49, %v198_v56  ;;  %v179_v4 = vmul.f32 %v178_v58, %v867_v1  ;;  %v155_v5 = vmul.f32 %v154_v60, %v869_v2  ;;  %v136_v55 = vsel %vm134_vm10, %v135_v35, %v133_v3 }
  0x9b   :  { %v711_v7 = vpop.eup %710  ;;  %v189_v13 = vsub.f32 1.5, %v188_v6  ;;  %vm981_vm6 = vcmp.eq.f32.partialorder %v226_v25, 8.507059e+37  ;;  %v282_v44 = vand.u32 2147483647, %v905_v46  ;;  %v394_v50 = vperm.slane %v920_v0, 0 }
  0x9c   :  { %v200_v10 = vmul.f32 0.5, %v199_v63  ;;  %v181_v11 = vsel %vm180_vm11, %v867_v1, %v179_v4  ;;  %v157_v12 = vsel %vm156_vm13, %v869_v2, %v155_v5  ;;  %v218_v14 = vmul.f32 %v711_v7, %v894_v38 }
  0x9d   :  { %v939_v15 = vpop.eup %712  ;;  %v160_v17 = vsel %vm158_vm14, %v159_v62, %v157_v12  ;;  %v184_v19 = vsel %vm182_vm12, %v183_v48, %v181_v11  ;;  %v190_v21 = vmul.f32 %v707_v42, %v189_v13  ;;  %v955_v2 = vadd.f32 1e-07, %v136_v55 }
  0x9e   :  { %v201_v18 = vsub.f32 1.5, %v200_v10  ;;  %v948_v20 = vadd.f32 1e-07, %v160_v17  ;;  %v219_v22 = vsub.f32 1.0, %v218_v14  ;;  %v274_v59 = vmul.f32 %v939_v15, %v905_v46 }
  0x9f   :  { %v191_v27 = vmul.f32 %v190_v21, %v877_v16  ;;  %v228_v1 = vand.u32 2147483648, %v894_v38  ;;  %v959_v29 = vadd.f32 1e-07, %v184_v19  ;;  %vm223_vm3 = vweird.f32 %v711_v7 }
  0xa0   :  { %v202_v24 = vmul.f32 %v709_v49, %v201_v18  ;;  %v220_v28 = vmul.f32 %v711_v7, %v219_v22  ;;  %714 = vrcp.f32 %v948_v20  ;;  %v275_v34 = vsub.f32 1.0, %v274_v59  ;;  %vm977_vm5 = vmor %vm222_vm4, %vm223_vm3 }
  0xa1   :  { %v193_v31 = vsel %vm192_vm15, %v877_v16, %v191_v27  ;;  %716 = vrcp.f32 %v950_v23  ;;  %v229_v42 = vor.u32 1.1754944e-38, %v228_v1  ;;  %vm279_vm7 = vweird.f32 %v939_v15 }
  0xa2   :  { %v203_v30 = vmul.f32 %v202_v24, %v883_v26  ;;  %v221_v33 = vadd.f32 %v711_v7, %v220_v28  ;;  %v196_v35 = vsel %vm194_vm0, %v195_v9, %v193_v31  ;;  %718 = vrcp.f32 %v955_v2  ;;  %v1037_v9 = vld [vmem:[%s1221_s6] ss:$0 sm:$0xff] }
  0xa3   :  { %v975_v37 = vadd.f32 1e-07, %v196_v35  ;;  %v276_v16 = vmul.f32 %v939_v15, %v275_v34  ;;  %720 = vrcp.f32 %v959_v29  ;;  %v284_v48 = vand.u32 2147483648, %v905_v46 }
  0xa4   :  { %v205_v36 = vsel %vm204_vm1, %v883_v26, %v203_v30  ;;  %v225_v38 = vsel %vm977_vm5, %v711_v7, %v221_v33  ;;  %v389_v26 = vrot.slane %v920_v0, 3  ;;  %v390_v49 = vrot.slane %v920_v0, 4  ;;  %v1073_v33 = vpop.permute.xlu2 %487 }
  0xa5   :  { %v208_v41 = vsel %vm206_vm2, %v207_v32, %v205_v36  ;;  %722 = vrcp.f32 %v975_v37  ;;  %v277_v43 = vadd.f32 %v939_v15, %v276_v16  ;;  %v230_v52 = vsel %vm981_vm6, %v229_v42, %v225_v38 }
  0xa6   :  { %v997_v47 = vpop.eup %714  ;;  %v268_v54 = vand.u32 2147483647, %v948_v20  ;;  %vm278_vm8 = vweird.f32 %v905_v46  ;;  %v270_v57 = vand.u32 2147483648, %v948_v20  ;;  %v398_v60 = vperm.slane %v390_v49, 0 }
  0xa7   :  { %v260_v53 = vmul.f32 %v997_v47, %v948_v20  ;;  %v1011_v56 = vpop.eup %716  ;;  %vm1016_vm9 = vmor %vm278_vm8, %vm279_vm7  ;;  %v410_v61 = vsub.f32 %v394_v50, %v995_v45  ;;  %v392_v62 = vrot.slane %v920_v0, 6  ;;  %v1024_v3 = vadd.f32 1e-07, %v208_v41 }
  0xa8   :  { %v1022_v63 = vpop.eup %718  ;;  %v281_v4 = vsel %vm1016_vm9, %v939_v15, %v277_v43  ;;  %vm283_vm10 = vcmp.eq.f32.partialorder %v282_v44, 8.507059e+37  ;;  %vm265_vm11 = vweird.f32 %v997_v47  ;;  %v285_v6 = vor.u32 1.1754944e-38, %v284_v48 }
  0xa9   :  { %v261_v46 = vsub.f32 1.0, %v260_v53  ;;  %v1029_v5 = vpop.eup %720  ;;  %v1032_v7 = vperm.slane %v389_v26, 0  ;;  %v418_v8 = vmul.f32 %v410_v61, %v230_v52  ;;  %v414_v12 = vsub.f32 %v398_v60, %v995_v45 }
  0xaa   :  { %v400_v13 = vperm.slane %v392_v62, 0  ;;  %v246_v14 = vmul.f32 %v1011_v56, %v950_v23  ;;  %v286_v15 = vsel %vm283_vm10, %v285_v6, %v281_v4  ;;  %v310_v17 = vand.u32 2147483647, %v975_v37 }
  0xab   :  { %v723_v10 = vpop.eup %722  ;;  %v262_v11 = vmul.f32 %v997_v47, %v261_v46  ;;  %v312_v18 = vand.u32 2147483648, %v975_v37  ;;  %vm264_vm12 = vweird.f32 %v948_v20  ;;  %vm1048_vm13 = vcmp.eq.f32.partialorder %v268_v54, 8.507059e+37 }
  0xac   :  { %v302_v55 = vmul.f32 %v723_v10, %v975_v37  ;;  %v271_v22 = vor.u32 1.1754944e-38, %v270_v57  ;;  %724 = vrcp.f32 %v1024_v3  ;;  %v430_v24 = vadd.f32 %v1037_v9, %v418_v8  ;;  %vm1057_vm15 = vmor %vm264_vm12, %vm265_vm11 }
  0xad   :  { %v263_v19 = vadd.f32 %v997_v47, %v262_v11  ;;  %vm306_vm14 = vweird.f32 %v975_v37  ;;  %v413_v20 = vsub.f32 %v1032_v7, %v995_v45  ;;  %v1063_v27 = vmul.f32 %v414_v12, %v286_v15  ;;  %v1109_v12 = vpop.permute.xlu2 %492 }
  0xae   :  { %v303_v25 = vsub.f32 1.0, %v302_v55  ;;  %v416_v28 = vsub.f32 %v400_v13, %v995_v45  ;;  %v247_v1 = vsub.f32 1.0, %v246_v14  ;;  %vm307_vm0 = vweird.f32 %v723_v10  ;;  %v483_v55 = vpop.permute.xlu1 %482 }
  0xaf   :  { %v267_v30 = vsel %vm1057_vm15, %v997_v47, %v263_v19  ;;  %vm1069_vm1 = vcmp.eq.f32.partialorder %v310_v17, 8.507059e+37  ;;  %v313_v32 = vor.u32 1.1754944e-38, %v312_v18  ;;  %vm251_vm2 = vweird.f32 %v1011_v56  ;;  %vm308_vm4 = vmor %vm306_vm14, %vm307_vm0  ;;  %v1120_v19 = vld [vmem:[%s1218_s3] sm:$0xff] }
  0xb0   :  { %v304_v34 = vmul.f32 %v723_v10, %v303_v25  ;;  %v248_v35 = vmul.f32 %v1011_v56, %v247_v1  ;;  %v254_v36 = vand.u32 2147483647, %v950_v23  ;;  %vm438_vm3 = vcmp.gt.f32.partialorder %v430_v24, 0.0 }
  0xb1   :  { %v256_v39 = vand.u32 2147483648, %v950_v23  ;;  %v388_v40 = vrot.slane %v920_v0, 2  ;;  %v288_v16 = vmul.f32 %v1029_v5, %v959_v29  ;;  %v446_v41 = vmul.f32 0.01, %v430_v24 }
  0xb2   :  { %v305_v38 = vadd.f32 %v723_v10, %v304_v34  ;;  %v249_v42 = vadd.f32 %v1011_v56, %v248_v35  ;;  %vm250_vm5 = vweird.f32 %v950_v23  ;;  %v1086_v43 = vpop.eup %724  ;;  %v272_v44 = vsel %vm1048_vm13, %v271_v22, %v267_v30 }
  0xb3   :  { %vm252_vm6 = vmor %vm250_vm5, %vm251_vm2  ;;  %v257_v47 = vor.u32 1.1754944e-38, %v256_v39  ;;  %v396_v48 = vperm.slane %v388_v40, 0  ;;  %v289_v26 = vsub.f32 1.0, %v288_v16  ;;  %vm255_vm7 = vcmp.eq.f32.partialorder %v254_v36, 8.507059e+37 }
  0xb4   :  { %v309_v49 = vsel %vm308_vm4, %v723_v10, %v305_v38  ;;  %v253_v50 = vsel %vm252_vm6, %v1011_v56, %v249_v42  ;;  %vm293_vm8 = vweird.f32 %v1029_v5  ;;  %vm292_vm9 = vweird.f32 %v959_v29  ;;  %v582_v42 = vld [vmem:[%s1222_s7 + $0x38] sm:$0xff] }
  0xb5   :  { %v314_v37 = vsel %vm1069_vm1, %v313_v32, %v309_v49  ;;  %v258_v52 = vsel %vm255_vm7, %v257_v47, %v253_v50  ;;  %v412_v23 = vsub.f32 %v396_v48, %v995_v45  ;;  %v290_v53 = vmul.f32 %v1029_v5, %v289_v26  ;;  %vm294_vm10 = vmor %vm292_vm9, %vm293_vm8  ;;  %615 = vmatpush.msra.mxu2 %v582_v42  ;;  %v503_v26 = vpop.permute.xlu2 %502 }
  0xb6   :  { %v424_v54 = vmul.f32 %v416_v28, %v314_v37  ;;  %v296_v57 = vand.u32 2147483647, %v959_v29  ;;  %v298_v58 = vand.u32 2147483648, %v959_v29  ;;  %v391_v61 = vrot.slane %v920_v0, 5  ;;  %v581_v37 = vld [vmem:[%s1222_s7 + $0x30] sm:$0xff] }
  0xb7   :  { %v420_v60 = vmul.f32 %v412_v23, %v258_v52  ;;  %v291_v56 = vadd.f32 %v1029_v5, %v290_v53  ;;  %v232_v62 = vmul.f32 %v1022_v63, %v955_v2  ;;  %v454_v46 = vsel %vm438_vm3, %v430_v24, %v446_v41  ;;  %v580_v52 = vld [vmem:[%s1222_s7 + $0x28] sm:$0xff]  ;;  %v498_v53 = vpop.permute.xlu1 %497  ;;  %616 = vmatpush.msra.mxu2 %v581_v37 }
  0xb8   :  { %v436_v4 = vadd.f32 %v1037_v9, %v424_v54  ;;  %vm297_vm11 = vcmp.eq.f32.partialorder %v296_v57, 8.507059e+37  ;;  %v299_v6 = vor.u32 1.1754944e-38, %v298_v58  ;;  %v399_v10 = vperm.slane %v391_v61, 0 }
  0xb9   :  { %v432_v8 = vadd.f32 %v1037_v9, %v420_v60  ;;  %v295_v29 = vsel %vm294_vm10, %v1029_v5, %v291_v56  ;;  %v233_v11 = vsub.f32 1.0, %v232_v62  ;;  %vm237_vm13 = vweird.f32 %v1022_v63  ;;  %v579_v60 = vld [vmem:[%s1222_s7 + $0x20] sm:$0xff]  ;;  %617 = vmatpush.msra.mxu2 %v580_v52 }
  0xba   :  { %vm444_vm12 = vcmp.gt.f32.partialorder %v436_v4, 0.0  ;;  %v452_v13 = vmul.f32 0.01, %v436_v4  ;;  %v300_v14 = vsel %vm297_vm11, %v299_v6, %v295_v29  ;;  %v415_v17 = vsub.f32 %v399_v10, %v995_v45  ;;  %v478_v6 = vpop.permute.xlu0 %477  ;;  %v578_v29 = vld [vmem:[%s1222_s7 + $0x18] sm:$0xff] }
  0xbb   :  { %vm440_vm14 = vcmp.gt.f32.partialorder %v432_v8, 0.0  ;;  %v448_v15 = vmul.f32 0.01, %v432_v8  ;;  %v234_v18 = vmul.f32 %v1022_v63, %v233_v11  ;;  %v421_v5 = vmul.f32 %v413_v20, %v272_v44  ;;  %618 = vmatpush.msra.mxu2 %v579_v60 }
  0xbc   :  { %v240_v21 = vand.u32 2147483647, %v955_v2  ;;  %v242_v22 = vand.u32 2147483648, %v955_v2  ;;  %v387_v24 = vrot.slane %v920_v0, 1  ;;  %v423_v59 = vmul.f32 %v415_v17, %v300_v14 }
  0xbd   :  { %v456_v25 = vsel %vm440_vm14, %v432_v8, %v448_v15  ;;  %v235_v28 = vadd.f32 %v1022_v63, %v234_v18  ;;  %vm236_vm15 = vweird.f32 %v955_v2  ;;  %v460_v7 = vsel %vm444_vm12, %v436_v4, %v452_v13  ;;  %v577_v18 = vld [vmem:[%s1222_s7 + $0x10] sm:$0xff]  ;;  %619 = vmatpush.msra.mxu2 %v578_v29 }
  0xbe   :  { %v464_v20 = vmul.f32 %v456_v25, %v1120_v19  ;;  %vm238_vm0 = vmor %vm236_vm15, %vm237_vm13  ;;  %v243_v1 = vor.u32 1.1754944e-38, %v242_v22  ;;  %v395_v30 = vperm.slane %v387_v24, 0  ;;  %v435_v31 = vadd.f32 %v1037_v9, %v423_v59 }
  0xbf   :  { %v239_v32 = vsel %vm238_vm0, %v1022_v63, %v235_v28  ;;  %vm241_vm1 = vcmp.eq.f32.partialorder %v240_v21, 8.507059e+37  ;;  %v462_v34 = vmul.f32 %v454_v46, %v1120_v19  ;;  %vm518_vm2 = vcmask 523264   ;;  %v576_v28 = vld [vmem:[%s1222_s7 + $0x8] sm:$0xff]  ;;  %620 = vmatpush.msra.mxu2 %v577_v18 }
  0xc0   :  { %v512_v35 = vmul.f32 %v483_v55, %v464_v20  ;;  %v244_v36 = vsel %vm241_vm1, %v243_v1, %v239_v32  ;;  %v411_v2 = vsub.f32 %v395_v30, %v995_v45  ;;  %v468_v39 = vmul.f32 %v460_v7, %v1120_v19 }
  0xc1   :  { %vm443_vm3 = vcmp.gt.f32.partialorder %v435_v31, 0.0  ;;  %v451_v40 = vmul.f32 0.01, %v435_v31  ;;  %v510_v16 = vmul.f32 %v1003_v51, %v462_v34  ;;  %v1139_v41 = vadd.f32 %v1037_v9, %v1063_v27  ;;  %621 = vmatpush.msra.mxu2 %v576_v28 }
  0xc2   :  { %v419_v38 = vmul.f32 %v411_v2, %v244_v36  ;;  %v316_v63 = vmul.f32 %v1086_v43, %v1024_v3  ;;  %v433_v44 = vadd.f32 %v1037_v9, %v421_v5  ;;  %v533_v51 = vsel %vm518_vm2, %v512_v35, 0.0  ;;  %v628_v5 = vld [vmem:[%s1223_s8] sm:$0xf] }
  0xc3   :  { %v459_v47 = vsel %vm443_vm3, %v435_v31, %v451_v40  ;;  %v519_v48 = vsel %vm518_vm2, %v510_v16, 0.0  ;;  %v516_v23 = vmul.f32 %v503_v26, %v468_v39  ;;  %vm442_vm4 = vcmp.gt.f32.partialorder %v1139_v41, 0.0 }
  0xc4   :  { %v467_v27 = vmul.f32 %v459_v47, %v1120_v19  ;;  %v431_v49 = vadd.f32 %v1037_v9, %v419_v38  ;;  %v520_v50 = vrot.slane %v519_v48, 4  ;;  %v317_v54 = vsub.f32 1.0, %v316_v63 }
  0xc5   :  { %v449_v56 = vmul.f32 0.01, %v433_v44  ;;  %v534_v61 = vrot.slane %v533_v51, 4  ;;  %vm441_vm6 = vcmp.gt.f32.partialorder %v433_v44, 0.0  ;;  %vm321_vm7 = vweird.f32 %v1086_v43 }
  0xc6   :  { %v515_v57 = vmul.f32 %v498_v53, %v467_v27  ;;  %vm439_vm5 = vcmp.gt.f32.partialorder %v431_v49, 0.0  ;;  %v447_v58 = vmul.f32 0.01, %v431_v49  ;;  %v521_v62 = vadd.f32 %v520_v50, %v519_v48  ;;  %v627_v27 = vld [vmem:[%s1219_s4] sm:$0xff] }
  0xc7   :  { %v318_v46 = vmul.f32 %v1086_v43, %v317_v54  ;;  %v326_v8 = vand.u32 2147483648, %v1024_v3  ;;  %v450_v10 = vmul.f32 0.01, %v1139_v41  ;;  %v561_v11 = vsel %vm518_vm2, %v516_v23, 0.0 }
  0xc8   :  { %v455_v4 = vsel %vm439_vm5, %v431_v49, %v447_v58  ;;  %v324_v14 = vand.u32 2147483647, %v1024_v3  ;;  %v554_v15 = vsel %vm518_vm2, %v515_v57, 0.0  ;;  %vm320_vm8 = vweird.f32 %v1024_v3 }
  0xc9   :  { %v463_v13 = vmul.f32 %v455_v4, %v1120_v19  ;;  %v319_v55 = vadd.f32 %v1086_v43, %v318_v46  ;;  %v393_v17 = vrot.slane %v920_v0, 7  ;;  %v457_v21 = vsel %vm441_vm6, %v433_v44, %v449_v56  ;;  %vm322_vm9 = vmor %vm320_vm8, %vm321_vm7 }
  0xca   :  { %v535_v22 = vadd.f32 %v534_v61, %v533_v51  ;;  %v522_v24 = vrot.slane %v521_v62, 2  ;;  %v327_v0 = vor.u32 1.1754944e-38, %v326_v8  ;;  %vm633_vm10 = vcmask 1043456   ;;  %v508_v61 = vpop.permute.xlu1 %507 }
  0xcb   :  { %v511_v25 = vmul.f32 %v478_v6, %v463_v13  ;;  %v323_v3 = vsel %vm322_vm9, %v1086_v43, %v319_v55  ;;  %v401_v59 = vperm.slane %v393_v17, 0  ;;  %v562_v7 = vrot.slane %v561_v11, 4  ;;  %685 = vmatpush.msk.msra.mxu3 %vm633_vm10, %v628_v5  ;;  %v575_v43 = vld [vmem:[%s1222_s7] sm:$0xff] }
  0xcc   :  { %v555_v20 = vrot.slane %v554_v15, 4  ;;  %vm325_vm11 = vcmp.eq.f32.partialorder %v324_v14, 8.507059e+37  ;;  %v458_v34 = vsel %vm442_vm4, %v1139_v41, %v450_v10  ;;  %v536_v35 = vrot.slane %v535_v22, 2  ;;  %622 = vmatpush.msra.mxu2 %v575_v43 }
  0xcd   :  { %v526_v1 = vsel %vm518_vm2, %v511_v25, 0.0  ;;  %v328_v31 = vsel %vm325_vm11, %v327_v0, %v323_v3  ;;  %v417_v32 = vsub.f32 %v401_v59, %v995_v45  ;;  %v523_v36 = vadd.f32 %v522_v24, %v521_v62 }
  0xce   :  { %v527_v30 = vrot.slane %v526_v1, 4  ;;  %v465_v2 = vmul.f32 %v457_v21, %v1120_v19  ;;  %v466_v39 = vmul.f32 %v458_v34, %v1120_v19  ;;  %v563_v38 = vadd.f32 %v562_v7, %v561_v11  ;;  %v693_v34 = vld [vmem:[%s1224_s9] ss:$0 sm:$0xff] }
  0xcf   :  { %v425_v16 = vmul.f32 %v417_v32, %v328_v31  ;;  %v556_v42 = vadd.f32 %v555_v20, %v554_v15  ;;  %v537_v41 = vadd.f32 %v536_v35, %v535_v22  ;;  %v524_v48 = vrot.slane %v523_v36, 1 }
  0xd0   :  { %v528_v40 = vadd.f32 %v527_v30, %v526_v1  ;;  %v513_v45 = vmul.f32 %v1073_v33, %v465_v2  ;;  %v514_v63 = vmul.f32 %v1109_v12, %v466_v39  ;;  %v564_v37 = vrot.slane %v563_v38, 2 }
  0xd1   :  { %v437_v47 = vadd.f32 %v1037_v9, %v425_v16  ;;  %vm629_vm13 = vcmask 31744   ;;  %v557_v52 = vrot.slane %v556_v42, 2  ;;  %v538_v54 = vrot.slane %v537_v41, 1 }
  0xd2   :  { %v529_v44 = vrot.slane %v528_v40, 2  ;;  %v540_v26 = vsel %vm518_vm2, %v513_v45, 0.0  ;;  %v547_v51 = vsel %vm518_vm2, %v514_v63, 0.0  ;;  %686 = vmatmul.msk.f32.vlgmr.msra.gmra.mxu3 %vm629_vm13, %v627_v27  ;;  %vm591_vm14 = vcmask 1041409  }
  0xd3   :  { %vm445_vm12 = vcmp.gt.f32.partialorder %v437_v47, 0.0  ;;  %v453_v50 = vmul.f32 0.01, %v437_v47  ;;  %v541_v33 = vrot.slane %v540_v26, 4  ;;  %v548_v12 = vrot.slane %v547_v51, 4 }
  0xd4   :  { %v530_v49 = vadd.f32 %v529_v44, %v528_v40  ;;  %v525_v60 = vadd.f32 %v524_v48, %v523_v36  ;;  %v565_v46 = vadd.f32 %v564_v37, %v563_v38  ;;  %v558_v8 = vadd.f32 %v557_v52, %v556_v42 }
  0xd5   :  { %v461_v9 = vsel %vm445_vm12, %v437_v47, %v453_v50  ;;  %v542_v53 = vadd.f32 %v541_v33, %v540_v26  ;;  %v549_v58 = vadd.f32 %v548_v12, %v547_v51  ;;  %vm593_vm15 = vcmask 1042434  }
  0xd6   :  { %v531_v23 = vrot.slane %v530_v49, 1  ;;  %v469_v57 = vmul.f32 %v461_v9, %v1120_v19  ;;  %v539_v11 = vadd.f32 %v538_v54, %v537_v41  ;;  %v566_v17 = vrot.slane %v565_v46, 1 }
  0xd7   :  { %v543_v62 = vrot.slane %v542_v53, 2  ;;  %v550_v6 = vrot.slane %v549_v58, 2  ;;  %vm595_vm0 = vcmask 1043459   ;;  %v559_v5 = vrot.slane %v558_v8, 1 }
  0xd8   :  { %v532_v56 = vadd.f32 %v531_v23, %v530_v49  ;;  %v517_v4 = vmul.f32 %v508_v61, %v469_v57  ;;  %vm597_vm1 = vcmask 1044484   ;;  %v567_v0 = vadd.f32 %v566_v17, %v565_v46 }
  0xd9   :  { %v544_v10 = vadd.f32 %v543_v62, %v542_v53  ;;  %v551_v14 = vadd.f32 %v550_v6, %v549_v58  ;;  %vm599_vm3 = vcmask 1045509   ;;  %v560_v28 = vadd.f32 %v559_v5, %v558_v8 }
  0xda   :  { %v592_v29 = vsel %vm591_vm14, %v532_v56, %v525_v60  ;;  %v568_v13 = vsel %vm518_vm2, %v517_v4, 0.0  ;;  %vm601_vm4 = vcmask 1046534   ;;  %vm603_vm5 = vcmask 1047559  }
  0xdb   :  { %v569_v15 = vrot.slane %v568_v13, 4  ;;  %v545_v55 = vrot.slane %v544_v10, 1  ;;  %v552_v19 = vrot.slane %v551_v14, 1  ;;  %v594_v18 = vsel %vm593_vm15, %v539_v11, %v592_v29 }
  0xdc   :  { %vm662_vm6 = vcmask 261120  }
  0xdd   :  { %v570_v21 = vadd.f32 %v569_v15, %v568_v13  ;;  %v546_v22 = vadd.f32 %v545_v55, %v544_v10  ;;  %v553_v24 = vadd.f32 %v552_v19, %v551_v14 }
  0xdf   :  { %v571_v25 = vrot.slane %v570_v21, 2  ;;  %v596_v3 = vsel %vm595_vm0, %v546_v22, %v594_v18 }
  0xe0   :  { %v598_v59 = vsel %vm597_vm1, %v553_v24, %v596_v3 }
  0xe1   :  { %v572_v7 = vadd.f32 %v571_v25, %v570_v21  ;;  %v600_v1 = vsel %vm599_vm3, %v560_v28, %v598_v59 }
  0xe2   :  { %v602_v30 = vsel %vm601_vm4, %v567_v0, %v600_v1 }
  0xe3   :  { %v573_v20 = vrot.slane %v572_v7, 1 }
  0xe5   :  { %v574_v31 = vadd.f32 %v573_v20, %v572_v7 }
  0xe7   :  { %v604_v32 = vsel %vm603_vm5, %v574_v31, %v602_v30 }
  0xe8   :  { %684 = vmatmul.msk.f32.vlgmr.msra.gmra.mxu2 %vm518_vm2, %v604_v32 }
 0x155   :  { %v654_v43 = vpop.f32.mrf.mxu3 }
 0x16b   :  { %v624_v35 = vpop.f32.mrf.mxu2 }
 0x16c   :  { %v655_v36 = vadd.f32 %v654_v43, %v624_v35 }
 0x16e   :  { %v661_v2 = vadd.f32 %v693_v34, %v655_v36 }
 0x170   :  { %663 = vst.msk [vmem:[#allocation2] sm:$0xff] %vm662_vm6, %v661_v2 }
 0x171   :  { %674 = dma.vmem_to_hbm [thread:$0]  %s670_s30, 128, %s672_s12, [#allocation3]  }
 0x172   :  { %750 = dma.done.wait [#allocation3], 128  }
 0x173   :  { %751 = vsyncadd [#allocation3], 4294967168 }
 0x174   :  { %679 = vsyncpa [#allocation3], 1 }

</bundles_post_ra>
